<compile_context>
chip_gen: v6e
topology: v6e:2x2x1
jax: 0.10.0
libtpu: 0.0.40
codegen_flags: <defaults>
</compile_context>

<pallas_src>
import functools

import jax
import jax.numpy as jnp
from jax.experimental import pallas as pl
from jax.experimental.pallas import tpu as pltpu

_LANE = 128
_SUBLANE = 8
_VMEM_TILE_BUDGET_BYTES = 24 * 1024 * 1024   # stay well under the 32 MiB scoped default
_SMALL_BATCH_XLA = 256                        # below this, plain XLA beats kernel launch cost


def _round_up(x, m):
    return ((x + m - 1) // m) * m


def _cdiv(a, b):
    return -(-a // b)


def _num_parallel_tensorcores():
    """'parallel' grid axes shard across 2 TCs on megacore (v4/v5p) and v7x chips."""
    try:
        kind = jax.devices()[0].device_kind.lower()
    except Exception:
        return 1
    if ("v5p" in kind) or ("v4" in kind) or ("v7" in kind) or ("7x" in kind):
        return 2
    return 1


def _choose_block_b(batch, d, c_pad, x_itemsize, out_itemsize):
    """Batch-tile size:
       * single-TC chips (v5e/v6e): one block per call (the grid is a serial loop),
       * dual-TC chips (v7x / megacore): >= 2 blocks so the parallel axis shards,
       * always capped so the double-buffered x + out tiles fit the scoped VMEM budget."""
    per_row = 2 * (d * x_itemsize + c_pad * out_itemsize)  # double-buffered pipelined tiles
    cap_rows = max(_SUBLANE, (_VMEM_TILE_BUDGET_BYTES // per_row) // _SUBLANE * _SUBLANE)
    n_cores = _num_parallel_tensorcores()
    min_blocks = n_cores if (n_cores > 1 and batch >= 64) else 1
    n_blocks = max(min_blocks, _cdiv(batch, cap_rows))
    return _round_up(_cdiv(batch, n_blocks), _SUBLANE)


def _mlp_heads_kernel(x_ref, w1_ref, b1_ref, w2_ref, b2_ref, wh_ref, bh_ref, o_ref):
    # x_ref:  (TB, D)            bf16 (default) or f32
    # w1_ref: (D, H)   b1_ref: (1, H)   (biases always f32)
    # w2_ref: (H, H)   b2_ref: (1, H)
    # wh_ref: (H, C_pad)  bh_ref: (1, C_pad)   (padded columns are zero)
    # o_ref:  (TB, C_pad)
    cd = w1_ref.dtype
    x = x_ref[...]

    # shared_mlp: Linear -> ReLU -> (Dropout p=0) -> Linear -> ReLU -> (Dropout p=0)
    h = jnp.dot(x, w1_ref[...], preferred_element_type=jnp.float32) + b1_ref[...]
    h = jnp.maximum(h, 0.0).astype(cd)
    h = jnp.dot(h, w2_ref[...], preferred_element_type=jnp.float32) + b2_ref[...]
    h = jnp.maximum(h, 0.0).astype(cd)

    # all heads fused: shared @ [W_head_0 | W_head_1 | ... | zero-pad] + [b | zero-pad]
    out = jnp.dot(h, wh_ref[...], preferred_element_type=jnp.float32) + bh_ref[...]
    o_ref[...] = out.astype(o_ref.dtype)


@functools.partial(jax.jit, static_argnames=("block_b", "head_sizes", "out_dtype"))
def _forward_pallas(x, w1, b1, w2, b2, w_heads, b_heads, *, block_b, head_sizes, out_dtype):
    B, D = x.shape
    H = w1.shape[1]
    C_pad = w_heads.shape[1]

    B_pad = _round_up(B, block_b)
    if B_pad != B:
        # keep every DMA / store full-width: pad the batch tail with zeros
        x = jnp.pad(x, ((0, B_pad - B), (0, 0)))
    grid = (B_pad // block_b,)

    flops = 2 * B_pad * (D * H + H * H + H * C_pad)
    bytes_accessed = (
        x.size * x.dtype.itemsize
        + (w1.size + w2.size + w_heads.size) * w1.dtype.itemsize
        + (b1.size + b2.size + b_heads.size) * 4
        + B_pad * C_pad * jnp.dtype(out_dtype).itemsize
    )

    fused = pl.pallas_call(
        _mlp_heads_kernel,
        out_shape=jax.ShapeDtypeStruct((B_pad, C_pad), out_dtype),
        grid_spec=pltpu.PrefetchScalarGridSpec(
            num_scalar_prefetch=0,
            grid=grid,
            in_specs=[
                pl.BlockSpec((block_b, D), lambda i: (i, 0)),   # x tile (pipelined)
                pl.BlockSpec((D, H), lambda i: (0, 0)),         # W1 (resident)
                pl.BlockSpec((1, H), lambda i: (0, 0)),         # b1
                pl.BlockSpec((H, H), lambda i: (0, 0)),         # W2
                pl.BlockSpec((1, H), lambda i: (0, 0)),         # b2
                pl.BlockSpec((H, C_pad), lambda i: (0, 0)),     # concatenated+padded head W
                pl.BlockSpec((1, C_pad), lambda i: (0, 0)),     # concatenated+padded head b
            ],
            # lane-dense output: last dim is a multiple of 128
            out_specs=pl.BlockSpec((block_b, C_pad), lambda i: (i, 0)),
        ),
        compiler_params=pltpu.CompilerParams(
            dimension_semantics=("parallel",),
        ),
        cost_estimate=pl.CostEstimate(
            flops=int(flops), transcendentals=0, bytes_accessed=int(bytes_accessed)
        ),
    )(x, w1, b1, w2, b2, w_heads, b_heads)

    # Per-head outputs sliced directly off the padded slab (batch trim + column split
    # in one slice each) -- no intermediate (B, c_total) copy of the slab is made.
    outs, off = [], 0
    for nc in head_sizes:
        outs.append(fused[:B, off:off + nc])
        off += nc
    return tuple(outs)


@functools.partial(jax.jit, static_argnames=("head_sizes", "out_dtype"))
def _forward_xla(x, w1, b1, w2, b2, w_heads, b_heads, *, head_sizes, out_dtype):
    """Small-batch fallback: same math, pure XLA (no pallas launch / pad / slice chain)."""
    cd = w1.dtype
    h = jnp.maximum(jnp.dot(x, w1, preferred_element_type=jnp.float32) + b1, 0.0).astype(cd)
    h = jnp.maximum(jnp.dot(h, w2, preferred_element_type=jnp.float32) + b2, 0.0).astype(cd)
    fused = (jnp.dot(h, w_heads, preferred_element_type=jnp.float32) + b_heads).astype(out_dtype)
    outs, off = [], 0
    for nc in head_sizes:
        outs.append(fused[:, off:off + nc])
        off += nc
    return tuple(outs)


class MultiHeadPropertyClassificationModelPallas:
    """JAX/Pallas port of the PyTorch module (dropout is inference-mode identity)."""

    def __init__(self, core_graph_vector_dim, num_classes_list, hidden_dim=128,
                 dropout=0.0, key=None, compute_dtype=jnp.bfloat16, out_dtype=None,
                 min_pallas_batch=_SMALL_BATCH_XLA):
        assert dropout == 0.0  # TODO(synk): training-mode dropout (p > 0) not implemented (forward uses p=0).
        D, H = core_graph_vector_dim, hidden_dim
        self.num_classes_list = list(num_classes_list)
        self.compute_dtype = jnp.dtype(compute_dtype)   # bf16 default (HBM-bound kernel)
        self.out_dtype = jnp.dtype(compute_dtype if out_dtype is None else out_dtype)
        self.min_pallas_batch = int(min_pallas_batch)
        if key is None:
            key = jax.random.PRNGKey(0)
        keys = jax.random.split(key, 4 + 2 * len(self.num_classes_list))

        def lin_init(kw, kb, fan_in, fan_out):
            # torch.nn.Linear default init: U(-1/sqrt(fan_in), 1/sqrt(fan_in))
            bound = 1.0 / float(jnp.sqrt(jnp.asarray(fan_in, jnp.float32)))
            w = jax.random.uniform(kw, (fan_in, fan_out), jnp.float32, -bound, bound)
            b = jax.random.uniform(kb, (1, fan_out), jnp.float32, -bound, bound)
            return w, b

        # shared_mlp weights (stored as [in, out] so the kernel does x @ W); biases stay f32.
        w1, self.b1 = lin_init(keys[0], keys[1], D, H)
        w2, self.b2 = lin_init(keys[2], keys[3], H, H)
        self.w1 = w1.astype(self.compute_dtype)
        self.w2 = w2.astype(self.compute_dtype)

        # per-head weights concatenated along the class axis, zero-padded to a multiple
        # of 128 lanes so the kernel output is lane-dense.
        ws, bs = [], []
        for i, nc in enumerate(self.num_classes_list):
            w, b = lin_init(keys[4 + 2 * i], keys[5 + 2 * i], H, nc)
            ws.append(w)
            bs.append(b)
        w_heads = jnp.concatenate(ws, axis=1)   # (H, C_total)
        b_heads = jnp.concatenate(bs, axis=1)   # (1, C_total)
        self.c_total = w_heads.shape[1]
        c_pad = max(_LANE, _round_up(self.c_total, _LANE))
        self.c_pad = c_pad
        self.w_heads = jnp.pad(w_heads, ((0, 0), (0, c_pad - self.c_total))).astype(self.compute_dtype)
        self.b_heads = jnp.pad(b_heads, ((0, 0), (0, c_pad - self.c_total)))  # f32, padded cols zero

    def __call__(self, z_core):
        B = z_core.shape[0]
        x = z_core.astype(self.compute_dtype)
        head_sizes = tuple(self.num_classes_list)

        if B < self.min_pallas_batch:
            outs = _forward_xla(x, self.w1, self.b1, self.w2, self.b2,
                                self.w_heads, self.b_heads,
                                head_sizes=head_sizes, out_dtype=self.out_dtype)
            return list(outs)

        block_b = _choose_block_b(B, x.shape[1], self.c_pad,
                                  self.compute_dtype.itemsize, self.out_dtype.itemsize)
        outs = _forward_pallas(x, self.w1, self.b1, self.w2, self.b2,
                               self.w_heads, self.b_heads,
                               block_b=block_b, head_sizes=head_sizes,
                               out_dtype=self.out_dtype)
        return list(outs)


def _reference_forward(model, z):
    """f32 reference that mirrors the kernel's bf16 quantization chain exactly
    (operands quantized to compute_dtype, accumulation in f32)."""
    cd = model.compute_dtype
    f32 = jnp.float32
    x = z.astype(cd).astype(f32)
    w1 = model.w1.astype(f32)
    w2 = model.w2.astype(f32)
    wh = model.w_heads.astype(f32)[:, :model.c_total]
    bh = model.b_heads[:, :model.c_total]
    h = jnp.maximum(x @ w1 + model.b1, 0.0).astype(cd).astype(f32)
    h = jnp.maximum(h @ w2 + model.b2, 0.0).astype(cd).astype(f32)
    fused = h @ wh + bh
    outs, off = [], 0
    for nc in model.num_classes_list:
        outs.append(fused[:, off:off + nc])
        off += nc
    return outs


if __name__ == "__main__":
    key = jax.random.PRNGKey(0)
    k1, k2, k3, kp = jax.random.split(key, 4)

    D, H = 32, 32
    num_classes_list = [4, 6, 3]

    # Model forced onto the Pallas path (min_pallas_batch=0) to exercise the kernel
    # at a small shape; default model keeps the XLA fallback for tiny batches.
    model_pallas = MultiHeadPropertyClassificationModelPallas(
        core_graph_vector_dim=D, num_classes_list=num_classes_list, hidden_dim=H,
        dropout=0.0, key=kp, min_pallas_batch=0)
    model_default = MultiHeadPropertyClassificationModelPallas(
        core_graph_vector_dim=D, num_classes_list=num_classes_list, hidden_dim=H,
        dropout=0.0, key=kp)

    def check(model, z, tag):
        outs = [jax.block_until_ready(o) for o in model(z)]
        refs = _reference_forward(model, z)
        for o, r, nc in zip(outs, refs, model.num_classes_list):
            assert o.shape == (z.shape[0], nc), (tag, o.shape)
            assert jnp.allclose(o.astype(jnp.float32), r, atol=2e-2, rtol=2e-2), \
                f"mismatch vs reference ({tag})"

    # --- small shape, Pallas kernel path -------------------------------------
    z_small = jax.random.normal(k1, (8, D), dtype=jnp.float32)
    check(model_pallas, z_small, "pallas-small")

    # --- mid-size batch with non-multiple-of-8 tail: batch padding + (on dual-TC
    #     chips) a 2-block parallel grid --------------------------------------
    z_mid = jax.random.normal(k2, (1037, D), dtype=jnp.float32)
    check(model_default, z_mid, "pallas-padded")

    # --- tiny batch on the default model: XLA fallback path ------------------
    z_tiny = jax.random.normal(k3, (16, D), dtype=jnp.float32)
    check(model_default, z_tiny, "xla-fallback")

    print("KERNEL_OK")
</pallas_src>

<mosaic_0001>
module attributes {stable_mosaic.version = 11 : i64} {
  func.func @_mlp_heads_kernel(%arg0: i32, %arg1: memref<8x32xbf16, #tpu.memory_space<vmem>>, %arg2: memref<32x32xbf16, #tpu.memory_space<vmem>>, %arg3: memref<1x32xf32, #tpu.memory_space<vmem>>, %arg4: memref<32x32xbf16, #tpu.memory_space<vmem>>, %arg5: memref<1x32xf32, #tpu.memory_space<vmem>>, %arg6: memref<32x128xbf16, #tpu.memory_space<vmem>>, %arg7: memref<1x128xf32, #tpu.memory_space<vmem>>, %arg8: memref<8x128xbf16, #tpu.memory_space<vmem>>) attributes {dimension_semantics = [#tpu.dimension_semantics<parallel>], iteration_bounds = array<i64: 1>, scalar_prefetch = 0 : i64, scratch_operands = 0 : i64, tpu.core_type = #tpu.core_type<tc>, window_params = [{transform_indices = @transform_0, window_bounds = array<i64: 8, 32>}, {pipeline_mode = #tpu.pipeline_mode<synchronous>, transform_indices = @transform_1, window_bounds = array<i64: 32, 32>}, {pipeline_mode = #tpu.pipeline_mode<synchronous>, transform_indices = @transform_2, window_bounds = array<i64: 1, 32>}, {pipeline_mode = #tpu.pipeline_mode<synchronous>, transform_indices = @transform_3, window_bounds = array<i64: 32, 32>}, {pipeline_mode = #tpu.pipeline_mode<synchronous>, transform_indices = @transform_4, window_bounds = array<i64: 1, 32>}, {pipeline_mode = #tpu.pipeline_mode<synchronous>, transform_indices = @transform_5, window_bounds = array<i64: 32, 128>}, {pipeline_mode = #tpu.pipeline_mode<synchronous>, transform_indices = @transform_6, window_bounds = array<i64: 1, 128>}, {transform_indices = @transform_7, window_bounds = array<i64: 8, 128>}]} {
    %c0 = arith.constant 0 : index
    %c0_0 = arith.constant 0 : index
    %0 = vector.load %arg1[%c0, %c0_0] : memref<8x32xbf16, #tpu.memory_space<vmem>>, vector<8x32xbf16>
    %c0_1 = arith.constant 0 : index
    %c0_2 = arith.constant 0 : index
    %1 = vector.load %arg2[%c0_1, %c0_2] : memref<32x32xbf16, #tpu.memory_space<vmem>>, vector<32x32xbf16>
    %cst = arith.constant dense<0.000000e+00> : vector<8x32xf32>
    %2 = tpu.matmul %0, %1, %cst {dimension_numbers = #tpu.dot_dimension_numbers<[1], [0], [0], [1], [0, 0, 1, 1], [], []>} : vector<8x32xbf16>, vector<32x32xbf16>, vector<8x32xf32> -> vector<8x32xf32>
    %c0_3 = arith.constant 0 : index
    %c0_4 = arith.constant 0 : index
    %3 = vector.load %arg3[%c0_3, %c0_4] : memref<1x32xf32, #tpu.memory_space<vmem>>, vector<1x32xf32>
    %4 = vector.broadcast %3 : vector<1x32xf32> to vector<8x32xf32>
    %5 = arith.addf %2, %4 : vector<8x32xf32>
    %cst_5 = arith.constant 0.000000e+00 : f32
    %6 = vector.broadcast %cst_5 : f32 to vector<8x32xf32>
    %7 = arith.maximumf %5, %6 : vector<8x32xf32>
    %8 = arith.truncf %7 : vector<8x32xf32> to vector<8x32xbf16>
    %c0_6 = arith.constant 0 : index
    %c0_7 = arith.constant 0 : index
    %9 = vector.load %arg4[%c0_6, %c0_7] : memref<32x32xbf16, #tpu.memory_space<vmem>>, vector<32x32xbf16>
    %cst_8 = arith.constant dense<0.000000e+00> : vector<8x32xf32>
    %10 = tpu.matmul %8, %9, %cst_8 {dimension_numbers = #tpu.dot_dimension_numbers<[1], [0], [0], [1], [0, 0, 1, 1], [], []>} : vector<8x32xbf16>, vector<32x32xbf16>, vector<8x32xf32> -> vector<8x32xf32>
    %c0_9 = arith.constant 0 : index
    %c0_10 = arith.constant 0 : index
    %11 = vector.load %arg5[%c0_9, %c0_10] : memref<1x32xf32, #tpu.memory_space<vmem>>, vector<1x32xf32>
    %12 = vector.broadcast %11 : vector<1x32xf32> to vector<8x32xf32>
    %13 = arith.addf %10, %12 : vector<8x32xf32>
    %cst_11 = arith.constant 0.000000e+00 : f32
    %14 = vector.broadcast %cst_11 : f32 to vector<8x32xf32>
    %15 = arith.maximumf %13, %14 : vector<8x32xf32>
    %16 = arith.truncf %15 : vector<8x32xf32> to vector<8x32xbf16>
    %c0_12 = arith.constant 0 : index
    %c0_13 = arith.constant 0 : index
    %17 = vector.load %arg6[%c0_12, %c0_13] : memref<32x128xbf16, #tpu.memory_space<vmem>>, vector<32x128xbf16>
    %cst_14 = arith.constant dense<0.000000e+00> : vector<8x128xf32>
    %18 = tpu.matmul %16, %17, %cst_14 {dimension_numbers = #tpu.dot_dimension_numbers<[1], [0], [0], [1], [0, 0, 1, 1], [], []>} : vector<8x32xbf16>, vector<32x128xbf16>, vector<8x128xf32> -> vector<8x128xf32>
    %c0_15 = arith.constant 0 : index
    %c0_16 = arith.constant 0 : index
    %19 = vector.load %arg7[%c0_15, %c0_16] : memref<1x128xf32, #tpu.memory_space<vmem>>, vector<1x128xf32>
    %20 = vector.broadcast %19 : vector<1x128xf32> to vector<8x128xf32>
    %21 = arith.addf %18, %20 : vector<8x128xf32>
    %22 = arith.truncf %21 : vector<8x128xf32> to vector<8x128xbf16>
    %c0_17 = arith.constant 0 : index
    %c0_18 = arith.constant 0 : index
    %23 = vector.load %arg8[%c0_17, %c0_18] : memref<8x128xbf16, #tpu.memory_space<vmem>>, vector<8x128xbf16>
    tpu.vector_store %arg8[%c0_17, %c0_18], %22 {strides = array<i32>} : memref<8x128xbf16, #tpu.memory_space<vmem>>, vector<8x128xbf16>,
    return
  }
  func.func @transform_0(%arg0: i32) -> (i32, i32) {
    %c0_i32 = arith.constant 0 : i32
    %c0_i32_0 = arith.constant 0 : i32
    return %arg0, %c0_i32 : i32, i32
  }
  func.func @transform_1(%arg0: i32) -> (i32, i32) {
    %c0_i32 = arith.constant 0 : i32
    %c0_i32_0 = arith.constant 0 : i32
    %c0_i32_1 = arith.constant 0 : i32
    return %c0_i32, %c0_i32_0 : i32, i32
  }
  func.func @transform_2(%arg0: i32) -> (i32, i32) {
    %c0_i32 = arith.constant 0 : i32
    %c0_i32_0 = arith.constant 0 : i32
    %c0_i32_1 = arith.constant 0 : i32
    return %c0_i32, %c0_i32_0 : i32, i32
  }
  func.func @transform_3(%arg0: i32) -> (i32, i32) {
    %c0_i32 = arith.constant 0 : i32
    %c0_i32_0 = arith.constant 0 : i32
    %c0_i32_1 = arith.constant 0 : i32
    return %c0_i32, %c0_i32_0 : i32, i32
  }
  func.func @transform_4(%arg0: i32) -> (i32, i32) {
    %c0_i32 = arith.constant 0 : i32
    %c0_i32_0 = arith.constant 0 : i32
    %c0_i32_1 = arith.constant 0 : i32
    return %c0_i32, %c0_i32_0 : i32, i32
  }
  func.func @transform_5(%arg0: i32) -> (i32, i32) {
    %c0_i32 = arith.constant 0 : i32
    %c0_i32_0 = arith.constant 0 : i32
    %c0_i32_1 = arith.constant 0 : i32
    return %c0_i32, %c0_i32_0 : i32, i32
  }
  func.func @transform_6(%arg0: i32) -> (i32, i32) {
    %c0_i32 = arith.constant 0 : i32
    %c0_i32_0 = arith.constant 0 : i32
    %c0_i32_1 = arith.constant 0 : i32
    return %c0_i32, %c0_i32_0 : i32, i32
  }
  func.func @transform_7(%arg0: i32) -> (i32, i32) {
    %c0_i32 = arith.constant 0 : i32
    %c0_i32_0 = arith.constant 0 : i32
    return %arg0, %c0_i32 : i32, i32
  }
}

</mosaic_0001>

<bundles_post_ra>
// kernel: _forward_pallas.1
= control target key start
LH: loop header
LB: loop body
LE: loop exit
PB: predicated region body
PF: predicated region fallthrough
CT: control target
= control target key end

     0   :  { %12 = vsyncpa [#allocation3], 0  ;;  %s522_s0 = inlined_call_operand.hbm [shape: bf16[8,32], index: 0, kind: input, shape index: {}]   ;;  %s523_s1 = inlined_call_operand.hbm [shape: bf16[32,32], index: 1, kind: input, shape index: {}]   ;;  %s524_s2 = inlined_call_operand.vmem [shape: f32[1,32], index: 2, kind: input, shape index: {}]   ;;  %s525_s3 = inlined_call_operand.hbm [shape: bf16[32,32], index: 3, kind: input, shape index: {}]   ;;  %s526_s4 = inlined_call_operand.vmem [shape: f32[1,32], index: 4, kind: input, shape index: {}]   ;;  %s527_s5 = inlined_call_operand.hbm [shape: bf16[32,128], index: 5, kind: input, shape index: {}]   ;;  %s528_s6 = inlined_call_operand.vmem [shape: f32[1,128], index: 6, kind: input, shape index: {}]   ;;  %s529_s7 = inlined_call_operand.vmem [shape: bf16[8,128], index: 7, kind: output, shape index: {}]  }
   0x1   :  { %13 = vsyncpa [#allocation5], 0 }
   0x2   :  { %14 = vsyncpa [#allocation8], 0  ;;  %s438_s24 = smov [#allocation4]  }
   0x3   :  { %s30_s25 = sshll.u32 %s438_s24, 4  ;;  %s31_s25 = int_to_ptr.vmem [resolvable:$true] %s30_s25 }
   0x4   :  { %s360_s26 = scalar_lea.vmem %s31_s25, 256  ;;  %p365_p1 = scmp.lt.s32.totalorder %s31_s25, %s31_s25 }
   0x5   :  { %p361_p0 = scmp.ne.s32.totalorder %s31_s25, %s360_s26  ;;  %p366_p2 = scmp.lt.s32.totalorder %s360_s26, %s360_s26 }
   0x7   :  { %p367_p3 = por %p366_p2, %p365_p1 }
   0x9   :  { %p368_p4 = pnand %p367_p3, %p361_p0 }
   0xb   :  { %371 = shalt.err (!%p368_p4)
}
   0xc   :  { %s439_s27 = smov 64   ;;  %s440_s28 = smov 4  }
   0xd   :  { %36 = dma.hbm_to_vmem [thread:$0]  %s523_s1, 256, %s31_s25, [#allocation5], %s439_s27, %s439_s27, %s440_s28  }
   0xe   :  { %s441_s8 = smov [#allocation2]   ;;  %s442_s10 = smov [#allocation6]  }
   0xf   :  { %s21_s9 = sshll.u32 %s441_s8, 4  ;;  %s44_s11 = sshll.u32 %s442_s10, 4  ;;  %s22_s9 = int_to_ptr.vmem [resolvable:$true] %s21_s9  ;;  %s45_s11 = int_to_ptr.vmem [resolvable:$true] %s44_s11 }
  0x10   :  { %s380_s12 = scalar_lea.vmem %s22_s9, 64  ;;  %p385_p6 = scmp.lt.s32.totalorder %s22_s9, %s22_s9 }
  0x11   :  { %p381_p5 = scmp.ne.s32.totalorder %s22_s9, %s380_s12  ;;  %p386_p7 = scmp.lt.s32.totalorder %s380_s12, %s380_s12 }
  0x13   :  { %p387_p8 = por %p386_p7, %p385_p6 }
  0x15   :  { %p388_p9 = pnand %p387_p8, %p381_p5 }
  0x17   :  { %391 = shalt.err (!%p388_p9)
}
  0x18   :  { %24 = dma.hbm_to_vmem [thread:$0]  %s522_s0, 64, %s22_s9, [#allocation3]  }
  0x19   :  { %s400_s15 = scalar_lea.vmem %s45_s11, 256  ;;  %p405_p11 = scmp.lt.s32.totalorder %s45_s11, %s45_s11 }
  0x1a   :  { %p401_p10 = scmp.ne.s32.totalorder %s45_s11, %s400_s15  ;;  %p406_p12 = scmp.lt.s32.totalorder %s400_s15, %s400_s15 }
  0x1c   :  { %p407_p13 = por %p406_p12, %p405_p11 }
  0x1e   :  { %p408_p0 = pnand %p407_p13, %p401_p10 }
  0x20   :  { %411 = shalt.err (!%p408_p0)
}
  0x21   :  { %50 = dma.hbm_to_vmem [thread:$0]  %s525_s3, 256, %s45_s11, [#allocation5], %s439_s27, %s439_s27, %s440_s28  }
  0x22   :  { %s443_s17 = smov [#allocation7]  }
  0x23   :  { %s58_s18 = sshll.u32 %s443_s17, 4  ;;  %s59_s18 = int_to_ptr.vmem [resolvable:$true] %s58_s18 }
  0x24   :  { %s420_s19 = scalar_lea.vmem %s59_s18, 256  ;;  %p425_p2 = scmp.lt.s32.totalorder %s59_s18, %s59_s18 }
  0x25   :  { %p421_p1 = scmp.ne.s32.totalorder %s59_s18, %s420_s19  ;;  %p426_p3 = scmp.lt.s32.totalorder %s420_s19, %s420_s19 }
  0x27   :  { %p427_p4 = por %p426_p3, %p425_p2 }
  0x29   :  { %p428_p5 = pnand %p427_p4, %p421_p1 }
  0x2b   :  { %431 = shalt.err (!%p428_p5)
}
  0x2c   :  { %64 = dma.hbm_to_vmem [thread:$0]  %s527_s5, 256, %s59_s18, [#allocation8], %s439_s27, %s439_s27, %s440_s28  }
  0x2d   :  { %432 = dma.done.wait [#allocation3], 64  }
  0x2e   :  { %433 = vsyncadd [#allocation3], 4294967232 }
  0x2f   :  { %434 = dma.done.wait [#allocation5], 512  }
  0x30   :  { %435 = vsyncadd [#allocation5], 4294966784 }
  0x31   :  { %436 = dma.done.wait [#allocation8], 256  }
  0x32   :  { %437 = vsyncadd [#allocation8], 4294967040  ;;  %v444_v0 = vmov 0.0   ;;  %vm445_vm0 = vmmov 0   ;;  %v346_v1 = vld [vmem:[#allocation4 + $0x8] sm:$0xff]   ;;  %v347_v2 = vld [vmem:[#allocation4] sm:$0xff]  }
  0x33   :  { %314 = vmatprep.subr.bf16.mxu0 %v444_v0  ;;  %318 = vmatprep.mubr.msk.bf16.mxu0 %vm445_vm0, %v444_v0  ;;  %v80_v3 = vld [vmem:[#allocation2] sm:$0xf]  ;;  %vm104_vm1 = vcmask 261120   ;;  %v349_v5 = vld [vmem:[#allocation6] sm:$0xff]   ;;  %v350_v6 = vld [vmem:[#allocation7 + $0x8] sm:$0xff]  }
  0x34   :  { %322 = vmatprep.subr.bf16.mxu1 %v444_v0  ;;  %326 = vmatprep.mubr.msk.bf16.mxu1 %vm445_vm0, %v444_v0  ;;  %v348_v4 = vld [vmem:[#allocation6 + $0x8] sm:$0xff]   ;;  %v351_v15 = vld [vmem:[#allocation7] sm:$0xff]  }
  0x35   :  { %315 = vmatpush3.bf16.msra.mxu0 %v346_v1  ;;  %323 = vmatpush3.bf16.msra.mxu1 %v348_v4  ;;  %v293_v7 = vld [vmem:[%s524_s2] ss:$0 sm:$0xff] }
  0x36   :  { %316 = vmatprep.subr.bf16.mxu0 %v444_v0  ;;  %324 = vmatprep.subr.bf16.mxu1 %v444_v0  ;;  %v297_v16 = vld [vmem:[%s526_s4] ss:$0 sm:$0xff] }
  0x37   :  { %v301_v24 = vld [vmem:[%s528_s6] ss:$0 sm:$0xff] }
  0x39   :  { %317 = vmatpush3.bf16.msra.mxu0 %v347_v2  ;;  %325 = vmatpush3.bf16.msra.mxu1 %v349_v5 }
  0x3a   :  { %330 = vmatprep.subr.bf16.mxu0 %v444_v0 }
  0x3c   :  { %319 = vmatmul.mubr.msk.bf16.vlgmr.msra.gmra.mxu0 %vm104_vm1, %v80_v3 }
  0x3d   :  { %334 = vmatprep.mubr.msk.bf16.mxu0 %vm445_vm0, %v444_v0  ;;  %331 = vmatpush3.bf16.msra.mxu0 %v350_v6 }
  0x3e   :  { %332 = vmatprep.subr.bf16.mxu0 %v444_v0 }
  0x41   :  { %333 = vmatpush3.bf16.msra.mxu0 %v351_v15 }
  0xfc   :  { %v142_v8 = vpop.f32.mrf.mxu0 }
  0xfd   :  { %v143_v9 = vadd.f32 %v293_v7, %v142_v8 }
  0xfe   :  { %v320_v10 = vpop.f32.mrf.mxu0 }
  0xff   :  { %v148_v11 = vmax.f32 %v143_v9, 0.0 }
 0x100   :  { %v145_v12 = vpop.f32.mrf.mxu0 }
 0x101   :  { %v149_v13 = vpack.c.bf16 %v148_v11, %v148_v11 }
 0x102   :  { %v321_v14 = vpop.f32.mrf.mxu0 }
 0x103   :  { %327 = vmatmul.mubr.msk.bf16.vlgmr.msra.gmra.mxu1 %vm104_vm1, %v149_v13 }
 0x1c3   :  { %v210_v17 = vpop.f32.mrf.mxu1 }
 0x1c4   :  { %v211_v18 = vadd.f32 %v297_v16, %v210_v17 }
 0x1c5   :  { %v328_v19 = vpop.f32.mrf.mxu1 }
 0x1c6   :  { %v216_v20 = vmax.f32 %v211_v18, 0.0 }
 0x1c7   :  { %v213_v21 = vpop.f32.mrf.mxu1 }
 0x1c8   :  { %v217_v22 = vpack.c.bf16 %v216_v20, %v216_v20 }
 0x1c9   :  { %v329_v23 = vpop.f32.mrf.mxu1 }
 0x1ca   :  { %335 = vmatmul.mubr.msk.bf16.vlgmr.msra.gmra.mxu0 %vm104_vm1, %v217_v22 }
 0x28a   :  { %v278_v25 = vpop.f32.mrf.mxu0 }
 0x28b   :  { %v279_v26 = vadd.f32 %v301_v24, %v278_v25 }
 0x28c   :  { %v336_v27 = vpop.f32.mrf.mxu0 }
 0x28d   :  { %v284_v28 = vpack.c.bf16 %v279_v26, %v279_v26 }
 0x28e   :  { %v281_v29 = vpop.f32.mrf.mxu0 }
 0x28f   :  { %285 = vst [vmem:[%s529_s7] sm:$0xf] %v284_v28 }
 0x290   :  { %v337_v30 = vpop.f32.mrf.mxu0 }
 0x291   :  { %290 = vsyncpa [#allocation3], 1 }
 0x292   :  { %291 = vsyncpa [#allocation5], 1 }
 0x293   :  { %292 = vsyncpa [#allocation8], 1 }

</bundles_post_ra>
